<compile_context>
chip_gen: v7x
topology: tpu7x:2x2x1
jax: 0.10.0
libtpu: 0.0.40
codegen_flags: <defaults>
</compile_context>

<pallas_src>
import functools

import jax
import jax.numpy as jnp
from jax.experimental import pallas as pl
from jax.experimental.pallas import tpu as pltpu

EPS = 1e-8  # RMSNorm eps (module default)


def _auto_mxu_dtype():
    """bf16 MXU inputs on bf16-native parts (v6e/v7x); exact f32 otherwise."""
    try:
        kind = jax.devices()[0].device_kind.lower()
    except Exception:  # pragma: no cover - be conservative
        return jnp.float32
    return jnp.bfloat16 if ("v6" in kind or "v7" in kind) else jnp.float32


def _toeplitz_conv_weight(w_hwio, W):
    """(K, K, Cin, Cout) HWIO -> block-Toeplitz (K*W*Cin, W*Cout) matrix.

    Row index  dy*(W*Cin) + j*Cin + c   (dy row-tap, input column j, channel c)
    Col index  w*Cout + co              (output column w, output channel co)
    Entry      w_hwio[dy, j-w+pad, c, co] when 0 <= j-w+pad < K else 0.
    The zero entries implement the conv's zero 'same' padding along W, so no
    padded copy of the activation is ever materialised.
    """
    K, _, Cin, Cout = w_hwio.shape
    pad = K // 2
    j = jnp.arange(W)[:, None]                    # input column
    w = jnp.arange(W)[None, :]                    # output column
    dx = j - w + pad                              # (W, W) tap index
    valid = (dx >= 0) & (dx < K)
    taps = w_hwio[:, jnp.clip(dx, 0, K - 1)]      # (K, W_j, W_w, Cin, Cout)
    taps = jnp.where(valid[None, :, :, None, None], taps, 0.0)
    taps = jnp.transpose(taps, (0, 1, 3, 2, 4))   # (K, W_j, Cin, W_w, Cout)
    return taps.reshape(K * W * Cin, W * Cout)


def _make_kernel(H, W, Cin, Cout, K, eps, mxu_dtype):
    pad = K // 2
    WC = W * Cin

    def kernel(x_ref, g_ref, gmat_ref, w_ref, b_ref, o_ref):
        # x_ref   : (1, H, W*Cin)        one image, lane-dense flat layout
        # g_ref   : (1, W*Cin)           RMSNorm gamma tiled per pixel column
        # gmat_ref: (W*Cin, W*Cin)       block-diagonal channel-mean matrix
        # w_ref   : (K*W*Cin, W*Cout)    block-Toeplitz conv weight (mxu_dtype)
        # b_ref   : (1, W*Cout)          conv bias tiled per pixel column
        # o_ref   : (1, H, W*Cout)       lane-dense output
        x = x_ref[0]                                            # (H, WC) f32

        # --- RMSNorm over channels (per pixel), fully lane-dense ------------
        # mean(x^2) over each pixel's Cin lanes via a block-diagonal matmul
        # (broadcast back onto the same lanes); EUP rsqrt, no divide.
        ms = jnp.dot(x * x, gmat_ref[...], preferred_element_type=jnp.float32)
        rn = x * (g_ref[...] * jax.lax.rsqrt(ms + eps))         # (H, WC)

        # --- im2col rows: K dy-shifted copies, lane-concatenated ------------
        # Row shifts use the (otherwise idle) XLU; zeroing the wrapped
        # boundary rows reproduces the conv's zero 'same' padding along H.
        row = jax.lax.broadcasted_iota(jnp.int32, (H, WC), 0)
        pieces = []
        for dy in range(K):
            off = dy - pad                       # -pad .. +pad
            if off == 0:
                p = rn
            else:
                p = pltpu.roll(rn, (-off) % H, axis=0)          # p[h]=rn[h+off]
                if off < 0:
                    p = jnp.where(row < -off, 0.0, p)           # top halo rows
                else:
                    p = jnp.where(row >= H - off, 0.0, p)       # bottom halo
            pieces.append(p)
        lhs = jnp.concatenate(pieces, axis=-1)                  # (H, K*WC)
        if mxu_dtype != jnp.float32:
            lhs = lhs.astype(mxu_dtype)                         # bf16 MXU path

        # --- single fused conv matmul + bias + ReLU --------------------------
        # The Toeplitz weight carries all K*K taps and the W zero-padding, so
        # the result lands directly in the lane-dense (h, w*Cout+co) layout
        # and is stored with unmasked full-lane stores.
        y = jnp.dot(lhs, w_ref[...], preferred_element_type=jnp.float32)
        o_ref[0] = jnp.maximum(y + b_ref[...], 0.0)

    return kernel


def conv_block_flat(xf, gamma, w_hwio, bias, *, eps=EPS, mxu_dtype=None):
    """Fused RMSNorm(C) -> KxK 'same' conv -> bias -> ReLU on flat (N,H,W*Cin)."""
    N, H, WC = xf.shape
    K = w_hwio.shape[0]
    Cin = w_hwio.shape[2]
    Cout = w_hwio.shape[-1]
    W = WC // Cin
    assert WC == W * Cin
    assert K % 2 == 1 and H >= K, "kernel must be odd and fit the image height"
    if mxu_dtype is None:
        mxu_dtype = _auto_mxu_dtype()

    # Parameter-only transforms (tiny; could be cached outside the step).
    gflat = jnp.tile(gamma.astype(jnp.float32), W).reshape(1, WC)
    gmat = jnp.kron(jnp.eye(W, dtype=jnp.float32),
                    jnp.full((Cin, Cin), 1.0 / Cin, jnp.float32))
    wbig = _toeplitz_conv_weight(w_hwio.astype(jnp.float32), W).astype(mxu_dtype)
    bflat = jnp.tile(bias.astype(jnp.float32), W).reshape(1, W * Cout)

    return pl.pallas_call(
        _make_kernel(H, W, Cin, Cout, K, eps, mxu_dtype),
        out_shape=jax.ShapeDtypeStruct((N, H, W * Cout), jnp.float32),
        grid=(N,),
        in_specs=[
            pl.BlockSpec((1, H, WC), lambda n: (n, 0, 0)),
            pl.BlockSpec((1, WC), lambda n: (0, 0)),
            pl.BlockSpec((WC, WC), lambda n: (0, 0)),
            pl.BlockSpec((K * WC, W * Cout), lambda n: (0, 0)),
            pl.BlockSpec((1, W * Cout), lambda n: (0, 0)),
        ],
        out_specs=pl.BlockSpec((1, H, W * Cout), lambda n: (n, 0, 0)),
        compiler_params=pltpu.CompilerParams(
            dimension_semantics=("parallel",)),
    )(xf, gflat, gmat, wbig, bflat)


def retained_shape_conv_block(params, x_nchw, *, eps=EPS, mxu_dtype=None):
    """Forward pass of the PyTorch RetainedShapeConvBlock.  x: (N, Cin, H, W).

    params: norm_weight (Cin,), conv_weight (K, K, Cin, Cout) [HWIO; permute
    torch's OIHW with (2, 3, 1, 0) to convert], conv_bias (Cout,).
    """
    N, Cin, H, W = x_nchw.shape
    Cout = params["conv_weight"].shape[-1]
    # NCHW -> lane-dense flat (N, H, W*Cin): one fused transpose copy, no pad.
    xf = jnp.transpose(x_nchw.astype(jnp.float32), (0, 2, 3, 1)).reshape(N, H, W * Cin)
    yf = conv_block_flat(xf, params["norm_weight"], params["conv_weight"],
                         params["conv_bias"], eps=eps, mxu_dtype=mxu_dtype)
    # Flat (N, H, W*Cout) -> NCHW: one fused transpose copy.
    return jnp.transpose(yf.reshape(N, H, W, Cout), (0, 3, 1, 2))


def _reference_forward(params, x_nchw, eps=EPS):
    """Pure-JAX reference mirroring the PyTorch module (for self-check)."""
    w = params["conv_weight"]
    pad = w.shape[0] // 2
    x = jnp.transpose(x_nchw, (0, 2, 3, 1)).astype(jnp.float32)
    var = jnp.mean(x * x, axis=-1, keepdims=True) + eps
    xn = params["norm_weight"] * x / jnp.sqrt(var)
    y = jax.lax.conv_general_dilated(
        xn, w, window_strides=(1, 1), padding=((pad, pad), (pad, pad)),
        dimension_numbers=("NHWC", "HWIO", "NHWC"),
        precision=jax.lax.Precision.HIGHEST)
    y = jnp.maximum(y + params["conv_bias"], 0.0)
    return jnp.transpose(y, (0, 3, 1, 2))


if __name__ == "__main__":
    # RetainedShapeConvBlock(in_channels=4, out_channels=32, kernel_size=3)
    N, CIN, H, W = 2, 4, 16, 16
    COUT, K = 32, 3

    key = jax.random.PRNGKey(0)
    kx, kg, kw, kb = jax.random.split(key, 4)
    x = jax.random.normal(kx, (N, CIN, H, W), jnp.float32)
    fan_in = float(CIN * K * K)
    params = {
        # torch init is ones; perturb so the gamma path is actually exercised.
        "norm_weight": 1.0 + 0.1 * jax.random.normal(kg, (CIN,), jnp.float32),
        "conv_weight": jax.random.normal(kw, (K, K, CIN, COUT), jnp.float32)
                       / (fan_in ** 0.5),                          # HWIO
        "conv_bias": 0.01 * jax.random.normal(kb, (COUT,), jnp.float32),
    }

    ref = _reference_forward(params, x)

    # Exact path: f32 MXU inputs, tight tolerance (catches tap misalignment).
    fwd_f32 = jax.jit(functools.partial(retained_shape_conv_block,
                                        mxu_dtype=jnp.float32))
    out = jax.block_until_ready(fwd_f32(params, x))
    assert out.shape == (N, COUT, H, W), out.shape
    assert bool(jnp.all(jnp.isfinite(out)))
    err = float(jnp.max(jnp.abs(out - ref)))
    assert err < 1e-4, f"f32 path: max abs error vs reference = {err}"

    # Auto path (bf16 MXU inputs on v6e/v7x, f32 elsewhere): loose tolerance.
    fwd_auto = jax.jit(retained_shape_conv_block)
    out_auto = jax.block_until_ready(fwd_auto(params, x))
    err_auto = float(jnp.max(jnp.abs(out_auto - ref)))
    assert err_auto < 5e-2, f"auto path: max abs error vs reference = {err_auto}"

    print("KERNEL_OK")
</pallas_src>

<mosaic_0001>
module attributes {stable_mosaic.version = 11 : i64} {
  func.func @kernel(%arg0: i32, %arg1: memref<1x16x64xf32, #tpu.memory_space<vmem>>, %arg2: memref<1x64xf32, #tpu.memory_space<vmem>>, %arg3: memref<64x64xf32, #tpu.memory_space<vmem>>, %arg4: memref<192x512xf32, #tpu.memory_space<vmem>>, %arg5: memref<1x512xf32, #tpu.memory_space<vmem>>, %arg6: memref<1x16x512xf32, #tpu.memory_space<vmem>>) attributes {dimension_semantics = [#tpu.dimension_semantics<parallel>], iteration_bounds = array<i64: 2>, scalar_prefetch = 0 : i64, scratch_operands = 0 : i64, tpu.core_type = #tpu.core_type<tc>, window_params = [{transform_indices = @transform_0, window_bounds = array<i64: 1, 16, 64>}, {pipeline_mode = #tpu.pipeline_mode<synchronous>, transform_indices = @transform_1, window_bounds = array<i64: 1, 64>}, {pipeline_mode = #tpu.pipeline_mode<synchronous>, transform_indices = @transform_2, window_bounds = array<i64: 64, 64>}, {pipeline_mode = #tpu.pipeline_mode<synchronous>, transform_indices = @transform_3, window_bounds = array<i64: 192, 512>}, {pipeline_mode = #tpu.pipeline_mode<synchronous>, transform_indices = @transform_4, window_bounds = array<i64: 1, 512>}, {transform_indices = @transform_5, window_bounds = array<i64: 1, 16, 512>}]} {
    %c0 = arith.constant 0 : index
    %c0_0 = arith.constant 0 : index
    %c0_1 = arith.constant 0 : index
    %0 = vector.load %arg1[%c0, %c0_0, %c0_1] : memref<1x16x64xf32, #tpu.memory_space<vmem>>, vector<1x16x64xf32>
    %1 = vector.shape_cast %0 : vector<1x16x64xf32> to vector<16x64xf32>
    %2 = arith.mulf %1, %1 : vector<16x64xf32>
    %c0_2 = arith.constant 0 : index
    %c0_3 = arith.constant 0 : index
    %3 = vector.load %arg3[%c0_2, %c0_3] : memref<64x64xf32, #tpu.memory_space<vmem>>, vector<64x64xf32>
    %cst = arith.constant dense<0.000000e+00> : vector<16x64xf32>
    %4 = tpu.matmul %2, %3, %cst {dimension_numbers = #tpu.dot_dimension_numbers<[1], [0], [0], [1], [0, 0, 1, 1], [], []>} : vector<16x64xf32>, vector<64x64xf32>, vector<16x64xf32> -> vector<16x64xf32>
    %c0_4 = arith.constant 0 : index
    %c0_5 = arith.constant 0 : index
    %5 = vector.load %arg2[%c0_4, %c0_5] : memref<1x64xf32, #tpu.memory_space<vmem>>, vector<1x64xf32>
    %cst_6 = arith.constant 9.99999993E-9 : f32
    %6 = vector.broadcast %cst_6 : f32 to vector<16x64xf32>
    %7 = arith.addf %4, %6 : vector<16x64xf32>
    %8 = math.rsqrt %7 : vector<16x64xf32>
    %9 = vector.broadcast %5 : vector<1x64xf32> to vector<16x64xf32>
    %10 = arith.mulf %9, %8 : vector<16x64xf32>
    %11 = arith.mulf %1, %10 : vector<16x64xf32>
    %12 = tpu.iota {dimensions = array<i32: 0>} : vector<16x64xi32>
    %c1_i32 = arith.constant 1 : i32
    %13 = tpu.dynamic_rotate %11 by %c1_i32 dim 0 : vector<16x64xf32>, i32 -> vector<16x64xf32>
    %c1_i32_7 = arith.constant 1 : i32
    %14 = vector.broadcast %c1_i32_7 : i32 to vector<16x64xi32>
    %15 = arith.cmpi slt, %12, %14 : vector<16x64xi32>
    %cst_8 = arith.constant 0.000000e+00 : f32
    %16 = vector.broadcast %cst_8 : f32 to vector<16x64xf32>
    %17 = arith.select %15, %16, %13 : vector<16x64xi1>, vector<16x64xf32>
    %c15_i32 = arith.constant 15 : i32
    %18 = tpu.dynamic_rotate %11 by %c15_i32 dim 0 : vector<16x64xf32>, i32 -> vector<16x64xf32>
    %c15_i32_9 = arith.constant 15 : i32
    %19 = vector.broadcast %c15_i32_9 : i32 to vector<16x64xi32>
    %20 = arith.cmpi sge, %12, %19 : vector<16x64xi32>
    %cst_10 = arith.constant 0.000000e+00 : f32
    %21 = vector.broadcast %cst_10 : f32 to vector<16x64xf32>
    %22 = arith.select %20, %21, %18 : vector<16x64xi1>, vector<16x64xf32>
    %23 = tpu.concatenate %17, %11, %22 in 1 : vector<16x64xf32>, vector<16x64xf32>, vector<16x64xf32> -> vector<16x192xf32>
    %c0_11 = arith.constant 0 : index
    %c0_12 = arith.constant 0 : index
    %24 = vector.load %arg4[%c0_11, %c0_12] : memref<192x512xf32, #tpu.memory_space<vmem>>, vector<192x512xf32>
    %cst_13 = arith.constant dense<0.000000e+00> : vector<16x512xf32>
    %25 = tpu.matmul %23, %24, %cst_13 {dimension_numbers = #tpu.dot_dimension_numbers<[1], [0], [0], [1], [0, 0, 1, 1], [], []>} : vector<16x192xf32>, vector<192x512xf32>, vector<16x512xf32> -> vector<16x512xf32>
    %c0_14 = arith.constant 0 : index
    %c0_15 = arith.constant 0 : index
    %26 = vector.load %arg5[%c0_14, %c0_15] : memref<1x512xf32, #tpu.memory_space<vmem>>, vector<1x512xf32>
    %27 = vector.broadcast %26 : vector<1x512xf32> to vector<16x512xf32>
    %28 = arith.addf %25, %27 : vector<16x512xf32>
    %cst_16 = arith.constant 0.000000e+00 : f32
    %29 = vector.broadcast %cst_16 : f32 to vector<16x512xf32>
    %30 = arith.maximumf %28, %29 : vector<16x512xf32>
    %c0_17 = arith.constant 0 : index
    %c0_18 = arith.constant 0 : index
    %c0_19 = arith.constant 0 : index
    %31 = vector.load %arg6[%c0_17, %c0_18, %c0_19] : memref<1x16x512xf32, #tpu.memory_space<vmem>>, vector<1x16x512xf32>
    %32 = vector.shape_cast %31 : vector<1x16x512xf32> to vector<16x512xf32>
    %33 = vector.shape_cast %30 : vector<16x512xf32> to vector<1x16x512xf32>
    tpu.vector_store %arg6[%c0_17, %c0_18, %c0_19], %33 {strides = array<i32>} : memref<1x16x512xf32, #tpu.memory_space<vmem>>, vector<1x16x512xf32>,
    return
  }
  func.func @transform_0(%arg0: i32) -> (i32, i32, i32) {
    %c0_i32 = arith.constant 0 : i32
    %c0_i32_0 = arith.constant 0 : i32
    %c0_i32_1 = arith.constant 0 : i32
    return %arg0, %c0_i32, %c0_i32_0 : i32, i32, i32
  }
  func.func @transform_1(%arg0: i32) -> (i32, i32) {
    %c0_i32 = arith.constant 0 : i32
    %c0_i32_0 = arith.constant 0 : i32
    %c0_i32_1 = arith.constant 0 : i32
    return %c0_i32, %c0_i32_0 : i32, i32
  }
  func.func @transform_2(%arg0: i32) -> (i32, i32) {
    %c0_i32 = arith.constant 0 : i32
    %c0_i32_0 = arith.constant 0 : i32
    %c0_i32_1 = arith.constant 0 : i32
    return %c0_i32, %c0_i32_0 : i32, i32
  }
  func.func @transform_3(%arg0: i32) -> (i32, i32) {
    %c0_i32 = arith.constant 0 : i32
    %c0_i32_0 = arith.constant 0 : i32
    %c0_i32_1 = arith.constant 0 : i32
    return %c0_i32, %c0_i32_0 : i32, i32
  }
  func.func @transform_4(%arg0: i32) -> (i32, i32) {
    %c0_i32 = arith.constant 0 : i32
    %c0_i32_0 = arith.constant 0 : i32
    %c0_i32_1 = arith.constant 0 : i32
    return %c0_i32, %c0_i32_0 : i32, i32
  }
  func.func @transform_5(%arg0: i32) -> (i32, i32, i32) {
    %c0_i32 = arith.constant 0 : i32
    %c0_i32_0 = arith.constant 0 : i32
    %c0_i32_1 = arith.constant 0 : i32
    return %arg0, %c0_i32, %c0_i32_0 : i32, i32, i32
  }
}

</mosaic_0001>

<bundles_post_ra>
// kernel: tile.18
= control target key start
LH: loop header
LB: loop body
LE: loop exit
PB: predicated region body
PF: predicated region fallthrough
CT: control target
= control target key end

     0   :  { %s28_s0 = inlined_call_operand.vmem [shape: f32[32], index: 0, kind: input, shape index: {}]   ;;  %s29_s1 = inlined_call_operand.vmem [shape: f32[16,32], index: 1, kind: output, shape index: {}]  }
   0x1   :  { %v4_v0 = vld [vmem:[%s28_s0] ss:$0 sm:$0xff] }
   0x2   :  { %5 = vst [vmem:[%s29_s1] sm:$0xff] %v4_v0  ;;  %8 = vst [vmem:[%s29_s1 + $0x8] sm:$0xff] %v4_v0 }

// kernel: tile.19
= control target key start
LH: loop header
LB: loop body
LE: loop exit
PB: predicated region body
PF: predicated region fallthrough
CT: control target
= control target key end

     0   :  { %s57_s8 = smov 96   ;;  %vm3_vm0 = vcmask 261120   ;;  %s59_s15 = smov 64   ;;  %vm9_vm1 = vcmask 1048320   ;;  %vm15_vm2 = vcmask 785920   ;;  %vm21_vm3 = vcmask 523520   ;;  %s94_s0 = inlined_call_operand.vmem [shape: f32[16,32], index: 0, kind: input, shape index: {}]   ;;  %s95_s1 = inlined_call_operand.vmem [shape: f32[1,512], index: 1, kind: output, shape index: {}]  }
   0x1   :  { %v48_v0 = vld [vmem:[%s94_s0 + $0x3] ss:$4 sm:$0xf]   ;;  %v49_v1 = vld [vmem:[%s94_s0 + $0x2] ss:$4 sm:$0xf]  }
   0x2   :  { %7 = vrot.lane.b32.xlu0 %v48_v0, %s57_s8  ;;  %v50_v2 = vld [vmem:[%s94_s0 + $0x1] ss:$4 sm:$0xf]   ;;  %v2_v3 = vld [vmem:[%s94_s0] ss:$4 sm:$0xf]  }
   0x3   :  { %s58_s0 = smov 32   ;;  %4 = vst.msk [vmem:[#allocation0] ss:$8 sm:$0xf] %vm3_vm0, %v2_v3  }
   0x4   :  { %19 = vrot.lane.b32.xlu1 %v50_v2, %s58_s0 }
   0x6   :  { %13 = vrot.lane.b32.xlu0 %v49_v1, %s59_s15 }
  0x74   :  { %v8_v4 = vpop.permute.xlu0 %7  }
  0x75   :  { %10 = vst.msk [vmem:[#allocation0] ss:$8 sm:$0xf] %vm9_vm1, %v8_v4  }
  0x76   :  { %v20_v5 = vpop.permute.xlu1 %19  }
  0x78   :  { %v14_v6 = vpop.permute.xlu0 %13  }
  0x79   :  { %16 = vst.msk [vmem:[#allocation0] ss:$8 sm:$0xf] %vm15_vm2, %v14_v6  }
  0x7a   :  { %22 = vst.msk [vmem:[#allocation0] ss:$8 sm:$0xf] %vm21_vm3, %v20_v5  }
  0x81   :  { %v26_v7 = vld [vmem:[#allocation0] sm:$0x1]  ;;  %v30_v8 = vld [vmem:[#allocation0 + $0x8] sm:$0x1]  ;;  %v35_v9 = vld [vmem:[#allocation0 + $0x10] sm:$0x1] }
  0x82   :  { %28 = vst [vmem:[%s95_s1] sm:$0x1] %v26_v7  ;;  %51 = vst [vmem:[%s95_s1 + $0x1] sm:$0x1] %v30_v8  ;;  %v41_v10 = vld [vmem:[#allocation0 + $0x18] sm:$0x1] }
  0x83   :  { %52 = vst [vmem:[%s95_s1 + $0x2] sm:$0x1] %v35_v9  ;;  %53 = vst [vmem:[%s95_s1 + $0x3] sm:$0x1] %v41_v10 }

// kernel: tile.13
= control target key start
LH: loop header
LB: loop body
LE: loop exit
PB: predicated region body
PF: predicated region fallthrough
CT: control target
= control target key end

     0   :  { %s28_s0 = inlined_call_operand.vmem [shape: f32[4], index: 0, kind: input, shape index: {}]   ;;  %s29_s1 = inlined_call_operand.vmem [shape: f32[16,4], index: 1, kind: output, shape index: {}]  }
   0x1   :  { %v4_v0 = vld [vmem:[%s28_s0] ss:$0 sm:$0xff] }
   0x2   :  { %5 = vst [vmem:[%s29_s1] sm:$0xff] %v4_v0  ;;  %8 = vst [vmem:[%s29_s1 + $0x8] sm:$0xff] %v4_v0 }

// kernel: tile.14
= control target key start
LH: loop header
LB: loop body
LE: loop exit
PB: predicated region body
PF: predicated region fallthrough
CT: control target
= control target key end

     0   :  { %s131_s10 = smov 60   ;;  %s132_s11 = smov 52   ;;  %vm3_vm0 = vcmask 31744   ;;  %vm9_vm1 = vcmask 523744   ;;  %vm15_vm2 = vcmask 490944   ;;  %vm21_vm3 = vcmask 458144   ;;  %s207_s0 = inlined_call_operand.vmem [shape: f32[16,4], index: 0, kind: input, shape index: {}]   ;;  %s208_s1 = inlined_call_operand.vmem [shape: f32[1,64], index: 1, kind: output, shape index: {}]  }
   0x1   :  { %v101_v0 = vld [vmem:[%s207_s0 + $0xf] sm:$0x1]   ;;  %v103_v1 = vld [vmem:[%s207_s0 + $0xd] sm:$0x1]   ;;  %v102_v2 = vld [vmem:[%s207_s0 + $0xe] sm:$0x1]  }
   0x2   :  { %7 = vrot.lane.b32.xlu0 %v101_v0, %s131_s10  ;;  %19 = vrot.lane.b32.xlu1 %v103_v1, %s132_s11  ;;  %v104_v3 = vld [vmem:[%s207_s0 + $0xc] sm:$0x1]   ;;  %s133_s16 = smov 56   ;;  %s134_s17 = smov 48   ;;  %v105_v4 = vld [vmem:[%s207_s0 + $0xb] sm:$0x1]  }
   0x3   :  { %v106_v5 = vld [vmem:[%s207_s0 + $0xa] sm:$0x1]   ;;  %v2_v6 = vld [vmem:[%s207_s0] sm:$0x1]   ;;  %s135_s24 = smov 44   ;;  %s136_s25 = smov 40  }
   0x4   :  { %4 = vst.msk [vmem:[#allocation0] sm:$0x1] %vm3_vm0, %v2_v6   ;;  %v107_v7 = vld [vmem:[%s207_s0 + $0x9] sm:$0x1]   ;;  %v108_v8 = vld [vmem:[%s207_s0 + $0x8] sm:$0x1]  }
   0x5   :  { %s137_s30 = smov 36   ;;  %s138_s2 = smov 32   ;;  %v109_v9 = vld [vmem:[%s207_s0 + $0x7] sm:$0x1]   ;;  %v110_v10 = vld [vmem:[%s207_s0 + $0x6] sm:$0x1]  }
   0x6   :  { %13 = vrot.lane.b32.xlu0 %v102_v2, %s133_s16  ;;  %25 = vrot.lane.b32.xlu1 %v104_v3, %s134_s17  ;;  %s139_s7 = smov 28   ;;  %s140_s8 = smov 24   ;;  %v111_v11 = vld [vmem:[%s207_s0 + $0x5] sm:$0x1]   ;;  %v112_v12 = vld [vmem:[%s207_s0 + $0x4] sm:$0x1]  }
   0x7   :  { %s141_s13 = smov 20   ;;  %s142_s14 = smov 16   ;;  %v113_v13 = vld [vmem:[%s207_s0 + $0x3] sm:$0x1]   ;;  %v114_v14 = vld [vmem:[%s207_s0 + $0x2] sm:$0x1]  }
   0x8   :  { %s143_s19 = smov 12   ;;  %s144_s20 = smov 8   ;;  %v115_v15 = vld [vmem:[%s207_s0 + $0x1] sm:$0x1]   ;;  %vm27_vm4 = vcmask 425344   ;;  %vm33_vm5 = vcmask 392544  }
   0x9   :  { %s145_s0 = smov 4   ;;  %vm39_vm6 = vcmask 359744   ;;  %vm45_vm7 = vcmask 326944   ;;  %vm51_vm8 = vcmask 294144   ;;  %vm57_vm9 = vcmask 261344  }
   0xa   :  { %31 = vrot.lane.b32.xlu0 %v105_v4, %s135_s24  ;;  %37 = vrot.lane.b32.xlu1 %v106_v5, %s136_s25  ;;  %vm63_vm10 = vcmask 228544   ;;  %vm69_vm11 = vcmask 195744   ;;  %vm75_vm12 = vcmask 162944   ;;  %vm81_vm13 = vcmask 130144  }
   0xb   :  { %vm87_vm14 = vcmask 97344   ;;  %vm93_vm15 = vcmask 64544  }
   0xe   :  { %43 = vrot.lane.b32.xlu0 %v107_v7, %s137_s30  ;;  %49 = vrot.lane.b32.xlu1 %v108_v8, %s138_s2 }
  0x12   :  { %55 = vrot.lane.b32.xlu0 %v109_v9, %s139_s7  ;;  %61 = vrot.lane.b32.xlu1 %v110_v10, %s140_s8 }
  0x16   :  { %67 = vrot.lane.b32.xlu0 %v111_v11, %s141_s13  ;;  %73 = vrot.lane.b32.xlu1 %v112_v12, %s142_s14 }
  0x1a   :  { %79 = vrot.lane.b32.xlu0 %v113_v13, %s143_s19  ;;  %85 = vrot.lane.b32.xlu1 %v114_v14, %s144_s20 }
  0x1e   :  { %91 = vrot.lane.b32.xlu0 %v115_v15, %s145_s0 }
  0x74   :  { %v8_v16 = vpop.permute.xlu0 %7   ;;  %v20_v17 = vpop.permute.xlu1 %19  }
  0x75   :  { %10 = vst.msk [vmem:[#allocation0] sm:$0x1] %vm9_vm1, %v8_v16  }
  0x78   :  { %v14_v18 = vpop.permute.xlu0 %13   ;;  %v26_v19 = vpop.permute.xlu1 %25  }
  0x79   :  { %16 = vst.msk [vmem:[#allocation0] sm:$0x1] %vm15_vm2, %v14_v18  }
  0x7a   :  { %22 = vst.msk [vmem:[#allocation0] sm:$0x1] %vm21_vm3, %v20_v17  }
  0x7b   :  { %28 = vst.msk [vmem:[#allocation0] sm:$0x1] %vm27_vm4, %v26_v19  }
  0x7c   :  { %v32_v20 = vpop.permute.xlu0 %31   ;;  %v38_v21 = vpop.permute.xlu1 %37  }
  0x7d   :  { %34 = vst.msk [vmem:[#allocation0] sm:$0x1] %vm33_vm5, %v32_v20  }
  0x7e   :  { %40 = vst.msk [vmem:[#allocation0] sm:$0x1] %vm39_vm6, %v38_v21  }
  0x80   :  { %v44_v22 = vpop.permute.xlu0 %43   ;;  %v50_v23 = vpop.permute.xlu1 %49  }
  0x81   :  { %46 = vst.msk [vmem:[#allocation0] sm:$0x1] %vm45_vm7, %v44_v22  }
  0x82   :  { %52 = vst.msk [vmem:[#allocation0] sm:$0x1] %vm51_vm8, %v50_v23  }
  0x84   :  { %v56_v24 = vpop.permute.xlu0 %55   ;;  %v62_v25 = vpop.permute.xlu1 %61  }
  0x85   :  { %58 = vst.msk [vmem:[#allocation0] sm:$0x1] %vm57_vm9, %v56_v24  }
  0x86   :  { %64 = vst.msk [vmem:[#allocation0] sm:$0x1] %vm63_vm10, %v62_v25  }
  0x88   :  { %v68_v26 = vpop.permute.xlu0 %67   ;;  %v74_v27 = vpop.permute.xlu1 %73  }
  0x89   :  { %70 = vst.msk [vmem:[#allocation0] sm:$0x1] %vm69_vm11, %v68_v26  }
  0x8a   :  { %76 = vst.msk [vmem:[#allocation0] sm:$0x1] %vm75_vm12, %v74_v27  }
  0x8c   :  { %v80_v28 = vpop.permute.xlu0 %79   ;;  %v86_v29 = vpop.permute.xlu1 %85  }
  0x8d   :  { %82 = vst.msk [vmem:[#allocation0] sm:$0x1] %vm81_vm13, %v80_v28  }
  0x8e   :  { %88 = vst.msk [vmem:[#allocation0] sm:$0x1] %vm87_vm14, %v86_v29  }
  0x90   :  { %v92_v30 = vpop.permute.xlu0 %91  }
  0x91   :  { %94 = vst.msk [vmem:[#allocation0] sm:$0x1] %vm93_vm15, %v92_v30  }
  0x98   :  { %v98_v31 = vld [vmem:[#allocation0] sm:$0x1] }
  0x99   :  { %100 = vst [vmem:[%s208_s1] sm:$0x1] %v98_v31 }

// kernel: retained_shape_conv_block.1
= control target key start
LH: loop header
LB: loop body
LE: loop exit
PB: predicated region body
PF: predicated region fallthrough
CT: control target
= control target key end

     0   :  { %s924_s18 = smov 0   ;;  %s1281_s0 = inlined_call_operand.vmem [shape: f32[2,16,64], index: 0, kind: input, shape index: {}]   ;;  %s1282_s1 = inlined_call_operand.vmem [shape: f32[1,64], index: 1, kind: input, shape index: {}]   ;;  %s1283_s2 = inlined_call_operand.vmem [shape: f32[64,64], index: 2, kind: input, shape index: {}]   ;;  %s1284_s3 = inlined_call_operand.vmem [shape: f32[192,512], index: 3, kind: input, shape index: {}]   ;;  %s1285_s4 = inlined_call_operand.vmem [shape: f32[1,512], index: 4, kind: input, shape index: {}]   ;;  %s1286_s5 = inlined_call_operand.vmem [shape: f32[2,16,512], index: 5, kind: output, shape index: {}]  }
   0x1 LB: > { %s711_s19 = sadd.s32 4294967295, %s891_s18   ;;  %p715_p0 = scmp.ge.s32.totalorder %s891_s18, 1  ;;  %s891_s18 = sphi %s924_s18, %s15_s18  }
   0x2   : > { %p187_p1 = scmp.lt.s32.totalorder %s891_s18, 3 }
   0x4   : > { %p188_p2 = pnand %p715_p0, %p187_p1 }
   0x5   : > { %v229_v0 = vld [vmem:[%s1283_s2] sm:$0xff] (!%p188_p2)  ;;  %v230_v1 = vld [vmem:[%s1283_s2 + $0x8] sm:$0xff] (!%p188_p2)  ;;  %v231_v2 = vld [vmem:[%s1283_s2 + $0x10] sm:$0xff] (!%p188_p2)  ;;  %p215_p3 = scmp.lt.s32.totalorder (!%p188_p2), %s711_s19, 1  ;;  %vm238_vm0 = vcmask (!%p188_p2), 523264   ;;  %s893_s27 = smov (!%p188_p2), 64  }
   0x6   : > { %191 = sbr.rel (%p188_p2) target bundleno = 592 (0x250), region = 40  ;;  %v760_v3 = vpack.c.bf16 (!%p188_p2), %v230_v1, %v229_v0  ;;  %v232_v4 = vld [vmem:[%s1283_s2 + $0x18] sm:$0xff] (!%p188_p2)  ;;  %v233_v6 = vld [vmem:[%s1283_s2 + $0x20] sm:$0xff] (!%p188_p2)  ;;  %v234_v7 = vld [vmem:[%s1283_s2 + $0x28] sm:$0xff] (!%p188_p2) }
   0x7   : > { %v764_v5 = vpack.c.bf16 (!%p188_p2), %v232_v4, %v231_v2  ;;  %v768_v8 = vpack.c.bf16 (!%p188_p2), %v234_v7, %v233_v6  ;;  %v235_v9 = vld [vmem:[%s1283_s2 + $0x30] sm:$0xff] (!%p188_p2)  ;;  %v236_v10 = vld [vmem:[%s1283_s2 + $0x38] sm:$0xff] (!%p188_p2)  ;;  %v363_v16 = vld [vmem:[%s1284_s3 + $0x8] sm:$0xff] (!%p188_p2) }
   0x8   : > { %761 = vmatprep.subr.bf16.mxu0 (!%p188_p2), %v760_v3  ;;  %v772_v13 = vpack.c.bf16 (!%p188_p2), %v236_v10, %v235_v9  ;;  %v367_v17 = vld [vmem:[%s1284_s3 + $0x28] sm:$0xff] (!%p188_p2)  ;;  %v365_v18 = vld [vmem:[%s1284_s3 + $0x18] sm:$0xff] (!%p188_p2)  ;;  %v362_v21 = vld [vmem:[%s1284_s3] sm:$0xff] (!%p188_p2) }
   0x9   : > { %763 = vmatpush3.bf16.msra.mxu0 (!%p188_p2), %v760_v3  ;;  %v776_v19 = vpack.c.bf16 (!%p188_p2), %v367_v17, %v363_v16  ;;  %v369_v20 = vld [vmem:[%s1284_s3 + $0x38] sm:$0xff] (!%p188_p2)  ;;  %v366_v22 = vld [vmem:[%s1284_s3 + $0x20] sm:$0xff] (!%p188_p2)  ;;  %v364_v25 = vld [vmem:[%s1284_s3 + $0x10] sm:$0xff] (!%p188_p2) }
   0xa   : > { %765 = vmatprep.subr.bf16.mxu0 (!%p188_p2), %v764_v5  ;;  %v824_v23 = vpack.c.bf16 (!%p188_p2), %v369_v20, %v365_v18  ;;  %v778_v24 = vpack.c.bf16 (!%p188_p2), %v366_v22, %v362_v21  ;;  %v368_v26 = vld [vmem:[%s1284_s3 + $0x30] sm:$0xff] (!%p188_p2)  ;;  %v371_v27 = vld [vmem:[%s1284_s3 + $0x48] sm:$0xff] (!%p188_p2)  ;;  %v373_v30 = vld [vmem:[%s1284_s3 + $0x58] sm:$0xff] (!%p188_p2) }
   0xb   : > { %777 = vmatprep.subr.bf16.mxu1 (!%p188_p2), %v776_v19  ;;  %v826_v28 = vpack.c.bf16 (!%p188_p2), %v368_v26, %v364_v25  ;;  %v375_v29 = vld [vmem:[%s1284_s3 + $0x68] sm:$0xff] (!%p188_p2)  ;;  %v377_v31 = vld [vmem:[%s1284_s3 + $0x78] sm:$0xff] (!%p188_p2)  ;;  %v370_v34 = vld [vmem:[%s1284_s3 + $0x40] sm:$0xff] (!%p188_p2) }
   0xc   : > { %779 = vmatpush1.bf16.msra.mxu1 (!%p188_p2), %v778_v24  ;;  %v780_v32 = vpack.c.bf16 (!%p188_p2), %v375_v29, %v371_v27  ;;  %v828_v33 = vpack.c.bf16 (!%p188_p2), %v377_v31, %v373_v30  ;;  %v374_v35 = vld [vmem:[%s1284_s3 + $0x60] sm:$0xff] (!%p188_p2)  ;;  %v372_v36 = vld [vmem:[%s1284_s3 + $0x50] sm:$0xff] (!%p188_p2)  ;;  %v379_v39 = vld [vmem:[%s1284_s3 + $0x88] sm:$0xff] (!%p188_p2) }
   0xd   : > { %s1288_s19 = smov (!%p215_p3, %s711_s19), 1  ;;  %767 = vmatpush3.bf16.msra.mxu0 %v764_v5  ;;  %v782_v37 = vpack.c.bf16 %v374_v35, %v370_v34  ;;  %v376_v38 = vld [vmem:[%s1284_s3 + $0x70] sm:$0xff]  ;;  %v383_v40 = vld [vmem:[%s1284_s3 + $0xa8] sm:$0xff]  ;;  %v381_v43 = vld [vmem:[%s1284_s3 + $0x98] sm:$0xff] }
   0xe   : > { %s729_s7 = sshll.u32 %s1288_s19, 4  ;;  %769 = vmatprep.subr.bf16.mxu0 %v768_v8  ;;  %781 = vmatprep.subr.bf16.mxu1 %v780_v32  ;;  %v830_v41 = vpack.c.bf16 %v376_v38, %v372_v36  ;;  %v784_v42 = vpack.c.bf16 %v383_v40, %v379_v39  ;;  %v385_v44 = vld [vmem:[%s1284_s3 + $0xb8] sm:$0xff]  ;;  %v378_v45 = vld [vmem:[%s1284_s3 + $0x80] sm:$0xff]  ;;  %v380_v48 = vld [vmem:[%s1284_s3 + $0x90] sm:$0xff]  ;;  %s730_s30 = sshll.u32 %s1288_s19, 6 }
   0xf   : > { %s219_s10 = scalar_lea.vmem %s1281_s0, %s729_s7  ;;  %v832_v46 = vpack.c.bf16 %v385_v44, %v381_v43  ;;  %v382_v47 = vld [vmem:[%s1284_s3 + $0xa0] sm:$0xff]  ;;  %v384_v49 = vld [vmem:[%s1284_s3 + $0xb0] sm:$0xff]  ;;  %v387_v51 = vld [vmem:[%s1284_s3 + $0xc8] sm:$0xff]  ;;  %s224_s8 = scalar_lea.vmem %s1286_s5, %s730_s30 }
  0x10   : > { %v962_v11 = vld [vmem:[%s219_s10] sm:$0xff]  ;;  %v967_v14 = vld [vmem:[%s219_s10 + $0x8] sm:$0xff]  ;;  %783 = vmatpush1.bf16.msra.mxu1 %v782_v37  ;;  %v786_v50 = vpack.c.bf16 %v382_v47, %v378_v45  ;;  %v389_v53 = vld [vmem:[%s1284_s3 + $0xd8] sm:$0xff]  ;;  %v834_v54 = vpack.c.bf16 %v384_v49, %v380_v48 }
  0x11   : > { %v227_v12 = vmul.f32 %v962_v11, %v962_v11  ;;  %771 = vmatpush3.bf16.msra.mxu0 %v768_v8  ;;  %v228_v15 = vmul.f32 %v967_v14, %v967_v14  ;;  %v391_v52 = vld [vmem:[%s1284_s3 + $0xe8] sm:$0xff]  ;;  %785 = vmatprep.subr.bf16.mxu1 %v784_v42  ;;  %v393_v56 = vld [vmem:[%s1284_s3 + $0xf8] sm:$0xff]  ;;  %v386_v57 = vld [vmem:[%s1284_s3 + $0xc0] sm:$0xff] }
  0x12   : > { %773 = vmatprep.subr.bf16.mxu0 %v772_v13  ;;  %v788_v55 = vpack.c.bf16 %v391_v52, %v387_v51  ;;  %v390_v58 = vld [vmem:[%s1284_s3 + $0xe0] sm:$0xff]  ;;  %v836_v59 = vpack.c.bf16 %v393_v56, %v389_v53  ;;  %v388_v60 = vld [vmem:[%s1284_s3 + $0xd0] sm:$0xff]  ;;  %v395_v62 = vld [vmem:[%s1284_s3 + $0x108] sm:$0xff] }
  0x13   : > { %757 = vmatprep.mubr.msk.f32.mxu0 %vm238_vm0, %v227_v12  ;;  %v392_v61 = vld [vmem:[%s1284_s3 + $0xf0] sm:$0xff]  ;;  %v399_v63 = vld [vmem:[%s1284_s3 + $0x128] sm:$0xff]  ;;  %v397_v0 = vld [vmem:[%s1284_s3 + $0x118] sm:$0xff]  ;;  %v790_v2 = vpack.c.bf16 %v390_v58, %v386_v57 }
  0x14   : > { %v401_v1 = vld [vmem:[%s1284_s3 + $0x138] sm:$0xff]  ;;  %787 = vmatpush1.bf16.msra.mxu1 %v786_v50  ;;  %v838_v3 = vpack.c.bf16 %v392_v61, %v388_v60  ;;  %v792_v4 = vpack.c.bf16 %v399_v63, %v395_v62  ;;  %v394_v5 = vld [vmem:[%s1284_s3 + $0x100] sm:$0xff]  ;;  %v396_v7 = vld [vmem:[%s1284_s3 + $0x110] sm:$0xff] }
  0x15   : > { %775 = vmatpush3.bf16.msra.mxu0 %v772_v13  ;;  %789 = vmatprep.subr.bf16.mxu1 %v788_v55  ;;  %v398_v6 = vld [vmem:[%s1284_s3 + $0x120] sm:$0xff]  ;;  %v840_v8 = vpack.c.bf16 %v401_v1, %v397_v0  ;;  %v400_v9 = vld [vmem:[%s1284_s3 + $0x130] sm:$0xff]  ;;  %v403_v10 = vld [vmem:[%s1284_s3 + $0x148] sm:$0xff] }
  0x16   : > { %825 = vmatprep.subr.bf16.mxu0 %v824_v23  ;;  %v407_v12 = vld [vmem:[%s1284_s3 + $0x168] sm:$0xff]  ;;  %v405_v13 = vld [vmem:[%s1284_s3 + $0x158] sm:$0xff]  ;;  %v794_v16 = vpack.c.bf16 %v398_v6, %v394_v5  ;;  %v842_v17 = vpack.c.bf16 %v400_v9, %v396_v7  ;;  %v402_v19 = vld [vmem:[%s1284_s3 + $0x140] sm:$0xff] }
  0x17   : > { %v796_v18 = vpack.c.bf16 %v407_v12, %v403_v10  ;;  %v406_v20 = vld [vmem:[%s1284_s3 + $0x160] sm:$0xff]  ;;  %v404_v21 = vld [vmem:[%s1284_s3 + $0x150] sm:$0xff]  ;;  %v411_v24 = vld [vmem:[%s1284_s3 + $0x188] sm:$0xff] }
  0x18   : > { %758 = vmatmul.mubr.msk.f32.vlgmr.msra.gmra.mrb[0].mxu0 %vm238_vm0, %v228_v15  ;;  %v409_v15 = vld [vmem:[%s1284_s3 + $0x178] sm:$0xff]  ;;  %791 = vmatpush1.bf16.msra.mxu1 %v790_v2  ;;  %v408_v23 = vld [vmem:[%s1284_s3 + $0x170] sm:$0xff]  ;;  %v415_v25 = vld [vmem:[%s1284_s3 + $0x1a8] sm:$0xff] }
  0x19   : > { %827 = vmatpush1.bf16.msra.mxu0 %v826_v28  ;;  %793 = vmatprep.subr.bf16.mxu1 %v792_v4  ;;  %v844_v22 = vpack.c.bf16 %v409_v15, %v405_v13  ;;  %v413_v26 = vld [vmem:[%s1284_s3 + $0x198] sm:$0xff]  ;;  %v798_v28 = vpack.c.bf16 %v406_v20, %v402_v19  ;;  %v846_v29 = vpack.c.bf16 %v408_v23, %v404_v21  ;;  %v410_v31 = vld [vmem:[%s1284_s3 + $0x180] sm:$0xff]  ;;  %v416_v35 = vld [vmem:[%s1284_s3 + $0x1b0] sm:$0xff] }
  0x1a   : > { %829 = vmatprep.subr.bf16.mxu0 %v828_v33  ;;  %v417_v27 = vld [vmem:[%s1284_s3 + $0x1b8] sm:$0xff]  ;;  %v800_v30 = vpack.c.bf16 %v415_v25, %v411_v24  ;;  %v414_v32 = vld [vmem:[%s1284_s3 + $0x1a0] sm:$0xff]  ;;  %v412_v33 = vld [vmem:[%s1284_s3 + $0x190] sm:$0xff] }
  0x1b   : > { %v848_v34 = vpack.c.bf16 %v417_v27, %v413_v26  ;;  %v419_v36 = vld [vmem:[%s1284_s3 + $0x1c8] sm:$0xff]  ;;  %v421_v38 = vld [vmem:[%s1284_s3 + $0x1d8] sm:$0xff]  ;;  %v802_v40 = vpack.c.bf16 %v414_v32, %v410_v31  ;;  %v418_v43 = vld [vmem:[%s1284_s3 + $0x1c0] sm:$0xff] }
  0x1c   : > { %795 = vmatpush1.bf16.msra.mxu1 %v794_v16  ;;  %v423_v37 = vld [vmem:[%s1284_s3 + $0x1e8] sm:$0xff]  ;;  %v425_v39 = vld [vmem:[%s1284_s3 + $0x1f8] sm:$0xff]  ;;  %v422_v44 = vld [vmem:[%s1284_s3 + $0x1e0] sm:$0xff] }
  0x1d   : > { %831 = vmatpush1.bf16.msra.mxu0 %v830_v41  ;;  %797 = vmatprep.subr.bf16.mxu1 %v796_v18  ;;  %v850_v41 = vpack.c.bf16 %v416_v35, %v412_v33  ;;  %v804_v42 = vpack.c.bf16 %v423_v37, %v419_v36  ;;  %v420_v45 = vld [vmem:[%s1284_s3 + $0x1d0] sm:$0xff]  ;;  %v427_v48 = vld [vmem:[%s1284_s3 + $0x208] sm:$0xff]  ;;  %v429_v50 = vld [vmem:[%s1284_s3 + $0x218] sm:$0xff]  ;;  %v806_v52 = vpack.c.bf16 %v422_v44, %v418_v43 }
  0x1e   : > { %833 = vmatprep.subr.bf16.mxu0 %v832_v46  ;;  %v852_v46 = vpack.c.bf16 %v425_v39, %v421_v38  ;;  %v424_v47 = vld [vmem:[%s1284_s3 + $0x1f0] sm:$0xff]  ;;  %v431_v49 = vld [vmem:[%s1284_s3 + $0x228] sm:$0xff]  ;;  %v433_v51 = vld [vmem:[%s1284_s3 + $0x238] sm:$0xff] }
  0x1f   : > { %v854_v53 = vpack.c.bf16 %v424_v47, %v420_v45  ;;  %v426_v55 = vld [vmem:[%s1284_s3 + $0x200] sm:$0xff]  ;;  %v428_v57 = vld [vmem:[%s1284_s3 + $0x210] sm:$0xff]  ;;  %v856_v58 = vpack.c.bf16 %v433_v51, %v429_v50  ;;  %v435_v60 = vld [vmem:[%s1284_s3 + $0x248] sm:$0xff] }
  0x20   : > { %799 = vmatpush1.bf16.msra.mxu1 %v798_v28  ;;  %v430_v56 = vld [vmem:[%s1284_s3 + $0x220] sm:$0xff]  ;;  %v439_v61 = vld [vmem:[%s1284_s3 + $0x268] sm:$0xff]  ;;  %v437_v62 = vld [vmem:[%s1284_s3 + $0x258] sm:$0xff] }
  0x21   : > { %835 = vmatpush1.bf16.msra.mxu0 %v834_v54  ;;  %801 = vmatprep.subr.bf16.mxu1 %v800_v30  ;;  %v808_v54 = vpack.c.bf16 %v431_v49, %v427_v48  ;;  %v441_v63 = vld [vmem:[%s1284_s3 + $0x278] sm:$0xff]  ;;  %v810_v0 = vpack.c.bf16 %v430_v56, %v426_v55  ;;  %v812_v2 = vpack.c.bf16 %v439_v61, %v435_v60  ;;  %v438_v4 = vld [vmem:[%s1284_s3 + $0x260] sm:$0xff]  ;;  %v436_v5 = vld [vmem:[%s1284_s3 + $0x250] sm:$0xff] }
  0x22   : > { %837 = vmatprep.subr.bf16.mxu0 %v836_v59  ;;  %v432_v59 = vld [vmem:[%s1284_s3 + $0x230] sm:$0xff]  ;;  %v860_v6 = vpack.c.bf16 %v441_v63, %v437_v62  ;;  %v447_v9 = vld [vmem:[%s1284_s3 + $0x2a8] sm:$0xff]  ;;  %v445_v10 = vld [vmem:[%s1284_s3 + $0x298] sm:$0xff] }
  0x23   : > { %v858_v1 = vpack.c.bf16 %v432_v59, %v428_v57  ;;  %v440_v7 = vld [vmem:[%s1284_s3 + $0x270] sm:$0xff]  ;;  %v449_v12 = vld [vmem:[%s1284_s3 + $0x2b8] sm:$0xff]  ;;  %v446_v18 = vld [vmem:[%s1284_s3 + $0x2a0] sm:$0xff] }
  0x24   : > { %803 = vmatpush1.bf16.msra.mxu1 %v802_v40  ;;  %v862_v15 = vpack.c.bf16 %v440_v7, %v436_v5  ;;  %v444_v19 = vld [vmem:[%s1284_s3 + $0x290] sm:$0xff]  ;;  %v864_v20 = vpack.c.bf16 %v449_v12, %v445_v10  ;;  %v455_v23 = vld [vmem:[%s1284_s3 + $0x2e8] sm:$0xff]  ;;  %v453_v24 = vld [vmem:[%s1284_s3 + $0x2d8] sm:$0xff]  ;;  %v332_v40 = vlaneseq }
  0x25   : > { %839 = vmatpush1.bf16.msra.mxu0 %v838_v3  ;;  %805 = vmatprep.subr.bf16.mxu1 %v804_v42  ;;  %v434_v3 = vld [vmem:[%s1284_s3 + $0x240] sm:$0xff]  ;;  %v448_v21 = vld [vmem:[%s1284_s3 + $0x2b0] sm:$0xff]  ;;  %v457_v25 = vld [vmem:[%s1284_s3 + $0x2f8] sm:$0xff] }
  0x26   : > { %841 = vmatprep.subr.bf16.mxu0 %v840_v8  ;;  %v443_v8 = vld [vmem:[%s1284_s3 + $0x288] sm:$0xff]  ;;  %v814_v13 = vpack.c.bf16 %v438_v4, %v434_v3  ;;  %v866_v27 = vpack.c.bf16 %v448_v21, %v444_v19  ;;  %v454_v30 = vld [vmem:[%s1284_s3 + $0x2e0] sm:$0xff]  ;;  %v868_v31 = vpack.c.bf16 %v457_v25, %v453_v24  ;;  %v452_v32 = vld [vmem:[%s1284_s3 + $0x2d0] sm:$0xff]  ;;  %v333_v45 = vshrl.u32 %v332_v40, 7 }
  0x27   : > { %v816_v16 = vpack.c.bf16 %v447_v9, %v443_v8  ;;  %v456_v33 = vld [vmem:[%s1284_s3 + $0x2f0] sm:$0xff] }
  0x28   : > { %807 = vmatpush1.bf16.msra.mxu1 %v806_v52  ;;  %v870_v35 = vpack.c.bf16 %v456_v33, %v452_v32  ;;  %vm345_vm1 = vcmp.lt.s32.totalorder %v333_v45, 7  ;;  %vm337_vm2 = vcmp.lt.s32.totalorder %v333_v45, 1  ;;  %v462_v62 = vsub.s32 0, %v333_v45 }
  0x29   : > { %843 = vmatpush1.bf16.msra.mxu0 %v842_v17  ;;  %809 = vmatprep.subr.bf16.mxu1 %v808_v54  ;;  %v442_v17 = vld [vmem:[%s1284_s3 + $0x280] sm:$0xff]  ;;  %v470_v63 = vsub.s32 2, %v333_v45 }
  0x2a   : > { %845 = vmatprep.subr.bf16.mxu0 %v844_v22  ;;  %v451_v22 = vld [vmem:[%s1284_s3 + $0x2c8] sm:$0xff]  ;;  %v818_v26 = vpack.c.bf16 %v446_v18, %v442_v17 }
  0x2b   : > { %v820_v28 = vpack.c.bf16 %v455_v23, %v451_v22 }
  0x2c   : > { %811 = vmatpush1.bf16.msra.mxu1 %v810_v0  ;;  %v458_v0 = vld [vmem:[%s1285_s4] sm:$0xf] }
  0x2d   : > { %847 = vmatpush1.bf16.msra.mxu0 %v846_v29  ;;  %813 = vmatprep.subr.bf16.mxu1 %v812_v2  ;;  %v450_v29 = vld [vmem:[%s1284_s3 + $0x2c0] sm:$0xff]  ;;  %v474_v2 = vsub.s32 3, %v333_v45  ;;  %v463_v3 = vrot.slane %v458_v0, %v462_v62  ;;  %v471_v4 = vrot.slane %v458_v0, %v470_v63 }
  0x2e   : > { %849 = vmatprep.subr.bf16.mxu0 %v848_v34  ;;  %v822_v34 = vpack.c.bf16 %v454_v30, %v450_v29 }
  0x30   : > { %815 = vmatpush1.bf16.msra.mxu1 %v814_v13 }
  0x31   : > { %851 = vmatpush1.bf16.msra.mxu0 %v850_v41  ;;  %817 = vmatprep.subr.bf16.mxu1 %v816_v16  ;;  %v722_v41 = vld [vmem:[%s1282_s1] ss:$0 sm:$0xff] }
  0x32   : > { %853 = vmatprep.subr.bf16.mxu0 %v852_v46 }
  0x34   : > { %819 = vmatpush1.bf16.msra.mxu1 %v818_v26 }
  0x35   : > { %855 = vmatpush1.bf16.msra.mxu0 %v854_v53  ;;  %821 = vmatprep.subr.bf16.mxu1 %v820_v28 }
  0x36   : > { %857 = vmatprep.subr.bf16.mxu0 %v856_v58 }
  0x38   : > { %823 = vmatpush1.bf16.msra.mxu1 %v822_v34 }
  0x39   : > { %859 = vmatpush1.bf16.msra.mxu0 %v858_v1  ;;  %v466_v1 = vsub.s32 1, %v333_v45 }
  0x3a   : > { %861 = vmatprep.subr.bf16.mxu0 %v860_v6  ;;  %v475_v6 = vrot.slane %v458_v0, %v474_v2 }
  0x3b   : > { %v467_v5 = vrot.slane %v458_v0, %v466_v1 }
  0x3d   : > { %863 = vmatpush1.bf16.msra.mxu0 %v862_v15 }
  0x3e   : > { %865 = vmatprep.subr.bf16.mxu0 %v864_v20 }
  0x41   : > { %867 = vmatpush1.bf16.msra.mxu0 %v866_v27 }
  0x42   : > { %869 = vmatprep.subr.bf16.mxu0 %v868_v31 }
  0x45   : > { %871 = vmatpush1.bf16.msra.mxu0 %v870_v35 }
  0xeb   : > { %v759_v36 = vpop.f32.mrb[0].mxu0 }
  0xec   : > { %v317_v37 = vadd.f32 1e-08, %v759_v36  ;;  %v311_v38 = vpop.f32.mrb[1].mxu0 }
  0xed   : > { %v312_v39 = vadd.f32 1e-08, %v311_v38 }
  0xee   : > { %881 = vrsqrt.f32 %v317_v37 }
  0xef   : > { %883 = vrsqrt.f32 %v312_v39 }
  0xf8   : > { %v882_v42 = vpop.eup %881 }
  0xf9   : > { %v884_v43 = vpop.eup %883  ;;  %v329_v44 = vmul.f32 %v882_v42, %v722_v41 }
  0xfa   : > { %v328_v46 = vmul.f32 %v884_v43, %v722_v41 }
  0xfb   : > { %v331_v47 = vmul.f32 %v329_v44, %v967_v14  ;;  %v334_v14 = vadd.s32 8, %v333_v45 }
  0xfc   : > { %v330_v48 = vmul.f32 %v328_v46, %v962_v11 }
  0xfd   : > { %v344_v49 = vrot.slane %v331_v47, 1  ;;  %v336_v50 = vrot.slane %v331_v47, 7  ;;  %vm349_vm3 = vcmp.ge.s32.totalorder %v334_v14, 15 }
  0xfe   : > { %354 = vrot.lane.b32.xlu0 %v330_v48, %s893_s27  ;;  %v335_v51 = vrot.slane %v330_v48, 7  ;;  %v343_v52 = vrot.slane %v330_v48, 1 }
 0x100   : > { %v346_v53 = vsel %vm345_vm1, %v343_v52, %v344_v49  ;;  %v339_v54 = vsel %vm337_vm2, %v336_v50, %v335_v51  ;;  %v347_v55 = vsel %vm345_vm1, %v344_v49, %v343_v52  ;;  %v338_v56 = vsel %vm337_vm2, %v335_v51, %v336_v50 }
 0x101   : > { %723 = vmatprep.mubr.msk.f32.mxu1 %vm238_vm0, %v346_v53  ;;  %725 = vmatprep.mubr.msk.f32.mxu0 %vm238_vm0, %v346_v53  ;;  %v341_v57 = vsel %vm337_vm2, 0.0, %v339_v54  ;;  %v351_v59 = vsel %vm349_vm3, 0.0, %v347_v55 }
 0x102   : > { %356 = vrot.lane.b32.xlu0 %v331_v47, %s893_s27 }
 0x170   : > { %v355_v11 = vpop.permute.xlu0 %354 }
 0x171   : > { %v360_v58 = vsel %vm238_vm0, %v341_v57, %v355_v11 }
 0x172   : > { %551 = vmatmul.mubr.f32.vlgmr.msra.gmra.mrb[0].mxu1 %v360_v58  ;;  %628 = vmatmul.mubr.f32.vlgmr.msra.gmra.mrb[2].mxu0 %v360_v58 }
 0x173   : > { %724 = vmatprep.mubr.msk.f32.mxu1 %vm238_vm0, %v351_v59  ;;  %726 = vmatprep.mubr.msk.f32.mxu0 %vm238_vm0, %v351_v59 }
 0x174   : > { %v357_v60 = vpop.permute.xlu0 %356 }
 0x175   : > { %v361_v61 = vsel %vm238_vm0, %v338_v56, %v357_v60 }
 0x176   : > { %557 = vmatmul.mubr.f32.gmra.mrb[2].mxu1 %v361_v61  ;;  %634 = vmatmul.mubr.f32.gmra.mrb[4].mxu0 %v361_v61 }
 0x245   : > { %v552_v7 = vpop.f32.mrb[0].mxu1  ;;  %v629_v8 = vpop.f32.mrb[2].mxu0 }
 0x246   : > { %v553_v9 = vadd.f32 %v552_v7, %v463_v3  ;;  %v630_v10 = vadd.f32 %v629_v8, %v471_v4  ;;  %v554_v12 = vpop.f32.mrb[1].mxu1  ;;  %v631_v13 = vpop.f32.mrb[3].mxu0 }
 0x247   : > { %v555_v15 = vadd.f32 %v554_v12, %v467_v5  ;;  %v632_v16 = vadd.f32 %v631_v13, %v475_v6 }
 0x248   : > { %v640_v17 = vmax.f32 %v553_v9, 0.0  ;;  %v642_v18 = vmax.f32 %v630_v10, 0.0 }
 0x249   : > { %v641_v19 = vmax.f32 %v555_v15, 0.0  ;;  %v643_v20 = vmax.f32 %v632_v16, 0.0  ;;  %v558_v21 = vpop.f32.mrb[2].mxu1  ;;  %v635_v22 = vpop.f32.mrb[4].mxu0 }
 0x24a   : > { %648 = vst [vmem:[%s224_s8] sm:$0xff] %v640_v17  ;;  %650 = vst [vmem:[%s224_s8 + $0x10] sm:$0xff] %v642_v18  ;;  %v559_v23 = vadd.f32 %v558_v21, %v463_v3  ;;  %v636_v24 = vadd.f32 %v635_v22, %v471_v4  ;;  %v560_v25 = vpop.f32.mrb[3].mxu1  ;;  %v637_v26 = vpop.f32.mrb[5].mxu0 }
 0x24b   : > { %649 = vst [vmem:[%s224_s8 + $0x8] sm:$0xff] %v641_v19  ;;  %651 = vst [vmem:[%s224_s8 + $0x18] sm:$0xff] %v643_v20  ;;  %v561_v27 = vadd.f32 %v560_v25, %v467_v5  ;;  %v638_v28 = vadd.f32 %v637_v26, %v475_v6 }
 0x24c   : > { %v644_v29 = vmax.f32 %v559_v23, 0.0  ;;  %v646_v30 = vmax.f32 %v636_v24, 0.0 }
 0x24d   : > { %v645_v31 = vmax.f32 %v561_v27, 0.0  ;;  %v647_v32 = vmax.f32 %v638_v28, 0.0 }
 0x24e   : > { %652 = vst [vmem:[%s224_s8 + $0x20] sm:$0xff] %v644_v29  ;;  %654 = vst [vmem:[%s224_s8 + $0x30] sm:$0xff] %v646_v30 }
 0x24f   : > { %653 = vst [vmem:[%s224_s8 + $0x28] sm:$0xff] %v645_v31  ;;  %655 = vst [vmem:[%s224_s8 + $0x38] sm:$0xff] %v647_v32 }
 0x250 PF: > { %s15_s18 = sadd.s32 1, %s891_s18  }
 0x251   : > { %p12_p4 = scmp.ge.s32.totalorder %s15_s18, 4  }
 0x253   :  { %14 = sbr.rel (!%p12_p4) target bundleno = 1 (0x1), region = 70 }

</bundles_post_ra>
